<compile_context>
chip_gen: v7x
topology: tpu7x:2x2x1
jax: 0.10.0
libtpu: 0.0.40
codegen_flags: <defaults>
</compile_context>

<pallas_src>
import jax
import jax.numpy as jnp
from jax.experimental import pallas as pl
from jax.experimental.pallas import tpu as pltpu

LEAKY_SLOPE = 0.2
BN_EPS = 1e-5
LANE = 128
SUBLANE = 8
VMEM_LIMIT = 32 * 1024 * 1024  # explicit scoped-VMEM budget; safe on v5e/v6e/v7x


def _leaky(x):
    return jnp.where(x > 0, x, LEAKY_SLOPE * x)


def _round_up(x, m):
    return ((x + m - 1) // m) * m


# ---------------------------------------------------------------------------
# Kernels
# ---------------------------------------------------------------------------
def gin_layer_kernel(adj_ref, x_ref, w1_ref, b1_ref, w2_ref, b2_ref,
                     o_ref, acc_ref):
    """One fused GINConv layer for a tile of node rows.

    grid = (node-row tiles i, contraction tiles k).  The k axis tiles the
    N-sized contraction of (A + I) @ X into a VMEM f32 accumulator; the MLP
    (Linear -> LeakyReLU -> BN(eval, pre-folded) -> Linear -> LeakyReLU) is
    applied once at k == last and stored lane-dense.
    """
    k = pl.program_id(1)

    @pl.when(k == 0)
    def _():
        acc_ref[...] = jnp.zeros_like(acc_ref)

    # Aggregation: (1 + eps) * x_i + sum_{j in N(i)} x_j  ==  (A + I) @ X
    acc_ref[...] += jnp.dot(adj_ref[...], x_ref[...],
                            preferred_element_type=jnp.float32)

    @pl.when(k == pl.num_programs(1) - 1)
    def _():
        agg = acc_ref[...].astype(w1_ref.dtype)
        # Linear 1 + LeakyReLU
        h = jnp.dot(agg, w1_ref[...], preferred_element_type=jnp.float32)
        h = _leaky(h + b1_ref[...])
        # BatchNorm1d (eval) already folded into (w2, b2) in the wrapper.
        # Linear 2 + LeakyReLU
        h = jnp.dot(h.astype(w2_ref.dtype), w2_ref[...],
                    preferred_element_type=jnp.float32)
        h = _leaky(h + b2_ref[...])
        o_ref[...] = h.astype(o_ref.dtype)


def head_kernel(pool_ref, x_ref, wfc_ref, bfc_ref, o_ref, acc_ref):
    """global_add_pool (as pool @ X) + BatchNorm(eval, folded) + final Linear."""
    k = pl.program_id(0)

    @pl.when(k == 0)
    def _():
        acc_ref[...] = jnp.zeros_like(acc_ref)

    acc_ref[...] += jnp.dot(pool_ref[...], x_ref[...],
                            preferred_element_type=jnp.float32)

    @pl.when(k == pl.num_programs(0) - 1)
    def _():
        pooled = acc_ref[...].astype(wfc_ref.dtype)
        out = jnp.dot(pooled, wfc_ref[...], preferred_element_type=jnp.float32)
        o_ref[...] = (out + bfc_ref[...]).astype(o_ref.dtype)


# ---------------------------------------------------------------------------
# pallas_call wrappers
# ---------------------------------------------------------------------------
def gin_layer(adj, x, w1, b1, w2, b2, *, tm, tk):
    n_pad = adj.shape[0]
    f_pad = x.shape[1]
    h_pad = w1.shape[1]
    grid = (n_pad // tm, n_pad // tk)
    return pl.pallas_call(
        gin_layer_kernel,
        out_shape=jax.ShapeDtypeStruct((n_pad, h_pad), x.dtype),
        grid=grid,
        in_specs=[
            pl.BlockSpec((tm, tk), lambda i, k: (i, k)),        # adjacency tile
            pl.BlockSpec((tk, f_pad), lambda i, k: (k, 0)),     # feature tile
            pl.BlockSpec((f_pad, h_pad), lambda i, k: (0, 0)),  # W1 (resident)
            pl.BlockSpec((1, h_pad), lambda i, k: (0, 0)),      # b1
            pl.BlockSpec((h_pad, h_pad), lambda i, k: (0, 0)),  # W2 (BN folded)
            pl.BlockSpec((1, h_pad), lambda i, k: (0, 0)),      # b2 (BN folded)
        ],
        out_specs=pl.BlockSpec((tm, h_pad), lambda i, k: (i, 0)),
        scratch_shapes=[pltpu.VMEM((tm, f_pad), jnp.float32)],
        compiler_params=pltpu.CompilerParams(
            dimension_semantics=("parallel", "arbitrary"),
            vmem_limit_bytes=VMEM_LIMIT),
    )(adj, x, w1, b1, w2, b2)


def head(pool, x, wfc, bfc, *, tk):
    g_pad = pool.shape[0]
    n_pad = pool.shape[1]
    h_pad = x.shape[1]
    l_pad = wfc.shape[1]
    grid = (n_pad // tk,)
    return pl.pallas_call(
        head_kernel,
        out_shape=jax.ShapeDtypeStruct((g_pad, l_pad), jnp.float32),
        grid=grid,
        in_specs=[
            pl.BlockSpec((g_pad, tk), lambda k: (0, k)),        # pooling tile
            pl.BlockSpec((tk, h_pad), lambda k: (k, 0)),        # feature tile
            pl.BlockSpec((h_pad, l_pad), lambda k: (0, 0)),     # fc W (BN folded)
            pl.BlockSpec((1, l_pad), lambda k: (0, 0)),         # fc b (BN folded)
        ],
        out_specs=pl.BlockSpec((g_pad, l_pad), lambda k: (0, 0)),
        scratch_shapes=[pltpu.VMEM((g_pad, h_pad), jnp.float32)],
        compiler_params=pltpu.CompilerParams(
            dimension_semantics=("arbitrary",),
            vmem_limit_bytes=VMEM_LIMIT),
    )(pool, x, wfc, bfc)


# ---------------------------------------------------------------------------
# Parameters (PyTorch-like, unpadded) and forward pass
# ---------------------------------------------------------------------------
def init_params(key, input_dim, hidden_dim, latent_dim, n_layers):
    params = {"convs": []}
    in_dim = input_dim
    for _ in range(n_layers):
        key, k1, k2, k3, k4, k5, k6 = jax.random.split(key, 7)
        w1 = jax.random.normal(k1, (in_dim, hidden_dim), jnp.float32) * 0.1
        b1 = jax.random.normal(k2, (hidden_dim,), jnp.float32) * 0.1
        gamma = 1.0 + jax.random.normal(k3, (hidden_dim,), jnp.float32) * 0.05
        beta = jax.random.normal(k4, (hidden_dim,), jnp.float32) * 0.05
        w2 = jax.random.normal(k5, (hidden_dim, hidden_dim), jnp.float32) * 0.1
        b2 = jax.random.normal(k6, (hidden_dim,), jnp.float32) * 0.1
        params["convs"].append((w1, b1, gamma, beta, w2, b2))
        in_dim = hidden_dim
    key, k1, k2, k3, k4 = jax.random.split(key, 5)
    params["bn_gamma"] = 1.0 + jax.random.normal(k1, (hidden_dim,), jnp.float32) * 0.05
    params["bn_beta"] = jax.random.normal(k2, (hidden_dim,), jnp.float32) * 0.05
    params["fc_w"] = jax.random.normal(k3, (hidden_dim, latent_dim), jnp.float32) * 0.1
    params["fc_b"] = jax.random.normal(k4, (latent_dim,), jnp.float32) * 0.1
    return params


def _pad2(a, rows, cols):
    return jnp.pad(a, ((0, rows - a.shape[0]), (0, cols - a.shape[1])))


def _pad_row(v, cols):
    return jnp.pad(v, (0, cols - v.shape[0]))[None, :]


def gin_forward(x, edge_index, batch, num_graphs, params,
                *, compute_dtype=jnp.bfloat16):
    n, f_in = x.shape
    hidden = params["convs"][0][0].shape[1]
    latent = params["fc_w"].shape[1]

    # Node tile: 256 keeps the v6e/v7x 256-wide MXU fed; fine on v5e too.
    tile = min(256, _round_up(n, LANE))
    n_pad = _round_up(n, tile)
    f_pad = _round_up(f_in, LANE)
    h_pad = _round_up(hidden, LANE)
    l_pad = _round_up(latent, LANE)
    g_pad = _round_up(num_graphs, SUBLANE)  # sublane-aligned head output

    # Dense aggregation matrix M = A + I (M[i, j] = #edges j->i), eps = 0.
    # Padded node rows/cols are zero edges -> they never touch real rows.
    src, dst = edge_index[0], edge_index[1]
    adj = jnp.zeros((n_pad, n_pad), jnp.float32).at[dst, src].add(1.0)
    adj = (adj + jnp.eye(n_pad, dtype=jnp.float32)).astype(compute_dtype)

    # Pooling matrix P[g, i] = 1 iff node i belongs to graph g.
    # Padded nodes get graph id g_pad (out of range) -> contribute nowhere.
    batch_pad = jnp.full((n_pad,), g_pad, jnp.int32).at[:n].set(batch)
    pool = (batch_pad[None, :] ==
            jnp.arange(g_pad, dtype=jnp.int32)[:, None]).astype(compute_dtype)

    h = _pad2(x, n_pad, f_pad).astype(compute_dtype)
    bn_scale = 1.0 / jnp.sqrt(jnp.float32(1.0) + BN_EPS)  # running stats (0, 1)

    in_pad = f_pad
    for (w1, b1, gamma, beta, w2, b2) in params["convs"]:
        # Fold eval-mode BatchNorm into the second Linear.
        scale = gamma * bn_scale
        w2f = scale[:, None] * w2
        b2f = beta @ w2 + b2
        w1p = _pad2(w1, in_pad, h_pad).astype(compute_dtype)
        b1p = _pad_row(b1, h_pad).astype(jnp.float32)
        w2p = _pad2(w2f, h_pad, h_pad).astype(compute_dtype)
        b2p = _pad_row(b2f, h_pad).astype(jnp.float32)
        h = gin_layer(adj, h, w1p, b1p, w2p, b2p, tm=tile, tk=tile)
        # F.dropout: identity in eval mode
        in_pad = h_pad

    # Fold the head BatchNorm into the final Linear.
    scale = params["bn_gamma"] * bn_scale
    wfcf = scale[:, None] * params["fc_w"]
    bfcf = params["bn_beta"] @ params["fc_w"] + params["fc_b"]
    wfcp = _pad2(wfcf, h_pad, l_pad).astype(compute_dtype)
    bfcp = _pad_row(bfcf, l_pad).astype(jnp.float32)

    out = head(pool, h, wfcp, bfcp, tk=tile)
    return out[:num_graphs, :latent]


def gin_forward_ref(x, edge_index, batch, num_graphs, params):
    """Pure-JAX f32 reference with the original (unfolded) semantics."""
    n = x.shape[0]
    src, dst = edge_index[0], edge_index[1]
    adj = jnp.zeros((n, n), jnp.float32).at[dst, src].add(1.0) + jnp.eye(n)
    inv = 1.0 / jnp.sqrt(1.0 + BN_EPS)
    h = x
    for (w1, b1, gamma, beta, w2, b2) in params["convs"]:
        agg = adj @ h
        t = _leaky(agg @ w1 + b1)
        t = t * (gamma * inv) + beta            # BatchNorm1d eval, stats (0, 1)
        h = _leaky(t @ w2 + b2)
    pool = (batch[None, :] == jnp.arange(num_graphs)[:, None]).astype(jnp.float32)
    p = pool @ h
    p = p * (params["bn_gamma"] * inv) + params["bn_beta"]
    return p @ params["fc_w"] + params["fc_b"]


if __name__ == "__main__":
    # Small synthetic graph batch: 16 nodes split across 2 graphs.
    N, E, G = 16, 40, 2
    INPUT_DIM, HIDDEN_DIM, LATENT_DIM, N_LAYERS = 8, 32, 16, 2

    key = jax.random.PRNGKey(0)
    key, kx, ke = jax.random.split(key, 3)
    x = jax.random.normal(kx, (N, INPUT_DIM), jnp.float32)
    edge_index = jax.random.randint(ke, (2, E), 0, N, dtype=jnp.int32)
    batch = jnp.concatenate([jnp.zeros(N // 2, jnp.int32),
                             jnp.ones(N - N // 2, jnp.int32)])

    params = init_params(key, INPUT_DIM, HIDDEN_DIM, LATENT_DIM, N_LAYERS)

    fwd = jax.jit(gin_forward, static_argnames=("num_graphs",))
    out = jax.block_until_ready(fwd(x, edge_index, batch, G, params))

    assert out.shape == (G, LATENT_DIM), out.shape
    assert jnp.all(jnp.isfinite(out))

    ref = gin_forward_ref(x, edge_index, batch, G, params)
    assert jnp.allclose(out, ref, atol=5e-2, rtol=5e-2), (out, ref)

    print("KERNEL_OK")
</pallas_src>

<mosaic_0001>
module attributes {stable_mosaic.version = 11 : i64} {
  func.func @gin_layer_kernel(%arg0: i32, %arg1: i32, %arg2: memref<128x128xbf16, #tpu.memory_space<vmem>>, %arg3: memref<128x128xbf16, #tpu.memory_space<vmem>>, %arg4: memref<128x128xbf16, #tpu.memory_space<vmem>>, %arg5: memref<1x128xf32, #tpu.memory_space<vmem>>, %arg6: memref<128x128xbf16, #tpu.memory_space<vmem>>, %arg7: memref<1x128xf32, #tpu.memory_space<vmem>>, %arg8: memref<128x128xbf16, #tpu.memory_space<vmem>>, %arg9: memref<128x128xf32, #tpu.memory_space<vmem>>) attributes {dimension_semantics = [#tpu.dimension_semantics<parallel>, #tpu.dimension_semantics<arbitrary>], iteration_bounds = array<i64: 1, 1>, scalar_prefetch = 0 : i64, scratch_operands = 1 : i64, tpu.core_type = #tpu.core_type<tc>, window_params = [{transform_indices = @transform_0, window_bounds = array<i64: 128, 128>}, {transform_indices = @transform_1, window_bounds = array<i64: 128, 128>}, {pipeline_mode = #tpu.pipeline_mode<synchronous>, transform_indices = @transform_2, window_bounds = array<i64: 128, 128>}, {pipeline_mode = #tpu.pipeline_mode<synchronous>, transform_indices = @transform_3, window_bounds = array<i64: 1, 128>}, {pipeline_mode = #tpu.pipeline_mode<synchronous>, transform_indices = @transform_4, window_bounds = array<i64: 128, 128>}, {pipeline_mode = #tpu.pipeline_mode<synchronous>, transform_indices = @transform_5, window_bounds = array<i64: 1, 128>}, {transform_indices = @transform_6, window_bounds = array<i64: 128, 128>}]} {
    %c0_i32 = arith.constant 0 : i32
    %0 = arith.cmpi eq, %arg1, %c0_i32 : i32
    %1 = arith.extui %0 : i1 to i32
    %c0_i32_0 = arith.constant 0 : i32
    %2 = arith.cmpi ne, %1, %c0_i32_0 : i32
    scf.if %2 {
      %cst_10 = arith.constant 0.000000e+00 : f32
      %12 = vector.broadcast %cst_10 : f32 to vector<128x128xf32>
      %c0_11 = arith.constant 0 : index
      %c0_12 = arith.constant 0 : index
      %13 = vector.load %arg9[%c0_11, %c0_12] : memref<128x128xf32, #tpu.memory_space<vmem>>, vector<128x128xf32>
      tpu.vector_store %arg9[%c0_11, %c0_12], %12 {strides = array<i32>} : memref<128x128xf32, #tpu.memory_space<vmem>>, vector<128x128xf32>,
    } else {
    }
    %c0 = arith.constant 0 : index
    %c0_1 = arith.constant 0 : index
    %3 = vector.load %arg9[%c0, %c0_1] : memref<128x128xf32, #tpu.memory_space<vmem>>, vector<128x128xf32>
    %c0_2 = arith.constant 0 : index
    %c0_3 = arith.constant 0 : index
    %4 = vector.load %arg2[%c0_2, %c0_3] : memref<128x128xbf16, #tpu.memory_space<vmem>>, vector<128x128xbf16>
    %c0_4 = arith.constant 0 : index
    %c0_5 = arith.constant 0 : index
    %5 = vector.load %arg3[%c0_4, %c0_5] : memref<128x128xbf16, #tpu.memory_space<vmem>>, vector<128x128xbf16>
    %cst = arith.constant dense<0.000000e+00> : vector<128x128xf32>
    %6 = tpu.matmul %4, %5, %cst {dimension_numbers = #tpu.dot_dimension_numbers<[1], [0], [0], [1], [0, 0, 1, 1], [], []>} : vector<128x128xbf16>, vector<128x128xbf16>, vector<128x128xf32> -> vector<128x128xf32>
    %7 = arith.addf %3, %6 : vector<128x128xf32>
    %c0_6 = arith.constant 0 : index
    %c0_7 = arith.constant 0 : index
    %8 = vector.load %arg9[%c0_6, %c0_7] : memref<128x128xf32, #tpu.memory_space<vmem>>, vector<128x128xf32>
    tpu.vector_store %arg9[%c0_6, %c0_7], %7 {strides = array<i32>} : memref<128x128xf32, #tpu.memory_space<vmem>>, vector<128x128xf32>,
    %c0_i32_8 = arith.constant 0 : i32
    %9 = arith.cmpi eq, %arg1, %c0_i32_8 : i32
    %10 = arith.extui %9 : i1 to i32
    %c0_i32_9 = arith.constant 0 : i32
    %11 = arith.cmpi ne, %10, %c0_i32_9 : i32
    scf.if %11 {
      %c0_10 = arith.constant 0 : index
      %c0_11 = arith.constant 0 : index
      %12 = vector.load %arg9[%c0_10, %c0_11] : memref<128x128xf32, #tpu.memory_space<vmem>>, vector<128x128xf32>
      %13 = arith.truncf %12 : vector<128x128xf32> to vector<128x128xbf16>
      %c0_12 = arith.constant 0 : index
      %c0_13 = arith.constant 0 : index
      %14 = vector.load %arg4[%c0_12, %c0_13] : memref<128x128xbf16, #tpu.memory_space<vmem>>, vector<128x128xbf16>
      %cst_14 = arith.constant dense<0.000000e+00> : vector<128x128xf32>
      %15 = tpu.matmul %13, %14, %cst_14 {dimension_numbers = #tpu.dot_dimension_numbers<[1], [0], [0], [1], [0, 0, 1, 1], [], []>} : vector<128x128xbf16>, vector<128x128xbf16>, vector<128x128xf32> -> vector<128x128xf32>
      %c0_15 = arith.constant 0 : index
      %c0_16 = arith.constant 0 : index
      %16 = vector.load %arg5[%c0_15, %c0_16] : memref<1x128xf32, #tpu.memory_space<vmem>>, vector<1x128xf32>
      %17 = vector.broadcast %16 : vector<1x128xf32> to vector<128x128xf32>
      %18 = arith.addf %15, %17 : vector<128x128xf32>
      %cst_17 = arith.constant 0.000000e+00 : f32
      %19 = vector.broadcast %cst_17 : f32 to vector<128x128xf32>
      %20 = arith.cmpf ogt, %18, %19 : vector<128x128xf32>
      %cst_18 = arith.constant 2.000000e-01 : f32
      %21 = vector.broadcast %cst_18 : f32 to vector<128x128xf32>
      %22 = arith.mulf %21, %18 : vector<128x128xf32>
      %23 = arith.select %20, %18, %22 : vector<128x128xi1>, vector<128x128xf32>
      %24 = arith.truncf %23 : vector<128x128xf32> to vector<128x128xbf16>
      %c0_19 = arith.constant 0 : index
      %c0_20 = arith.constant 0 : index
      %25 = vector.load %arg6[%c0_19, %c0_20] : memref<128x128xbf16, #tpu.memory_space<vmem>>, vector<128x128xbf16>
      %cst_21 = arith.constant dense<0.000000e+00> : vector<128x128xf32>
      %26 = tpu.matmul %24, %25, %cst_21 {dimension_numbers = #tpu.dot_dimension_numbers<[1], [0], [0], [1], [0, 0, 1, 1], [], []>} : vector<128x128xbf16>, vector<128x128xbf16>, vector<128x128xf32> -> vector<128x128xf32>
      %c0_22 = arith.constant 0 : index
      %c0_23 = arith.constant 0 : index
      %27 = vector.load %arg7[%c0_22, %c0_23] : memref<1x128xf32, #tpu.memory_space<vmem>>, vector<1x128xf32>
      %28 = vector.broadcast %27 : vector<1x128xf32> to vector<128x128xf32>
      %29 = arith.addf %26, %28 : vector<128x128xf32>
      %cst_24 = arith.constant 0.000000e+00 : f32
      %30 = vector.broadcast %cst_24 : f32 to vector<128x128xf32>
      %31 = arith.cmpf ogt, %29, %30 : vector<128x128xf32>
      %cst_25 = arith.constant 2.000000e-01 : f32
      %32 = vector.broadcast %cst_25 : f32 to vector<128x128xf32>
      %33 = arith.mulf %32, %29 : vector<128x128xf32>
      %34 = arith.select %31, %29, %33 : vector<128x128xi1>, vector<128x128xf32>
      %35 = arith.truncf %34 : vector<128x128xf32> to vector<128x128xbf16>
      %c0_26 = arith.constant 0 : index
      %c0_27 = arith.constant 0 : index
      %36 = vector.load %arg8[%c0_26, %c0_27] : memref<128x128xbf16, #tpu.memory_space<vmem>>, vector<128x128xbf16>
      tpu.vector_store %arg8[%c0_26, %c0_27], %35 {strides = array<i32>} : memref<128x128xbf16, #tpu.memory_space<vmem>>, vector<128x128xbf16>,
    } else {
    }
    return
  }
  func.func @transform_0(%arg0: i32, %arg1: i32) -> (i32, i32) {
    %c0_i32 = arith.constant 0 : i32
    return %arg0, %arg1 : i32, i32
  }
  func.func @transform_1(%arg0: i32, %arg1: i32) -> (i32, i32) {
    %c0_i32 = arith.constant 0 : i32
    %c0_i32_0 = arith.constant 0 : i32
    return %arg1, %c0_i32 : i32, i32
  }
  func.func @transform_2(%arg0: i32, %arg1: i32) -> (i32, i32) {
    %c0_i32 = arith.constant 0 : i32
    %c0_i32_0 = arith.constant 0 : i32
    %c0_i32_1 = arith.constant 0 : i32
    return %c0_i32, %c0_i32_0 : i32, i32
  }
  func.func @transform_3(%arg0: i32, %arg1: i32) -> (i32, i32) {
    %c0_i32 = arith.constant 0 : i32
    %c0_i32_0 = arith.constant 0 : i32
    %c0_i32_1 = arith.constant 0 : i32
    return %c0_i32, %c0_i32_0 : i32, i32
  }
  func.func @transform_4(%arg0: i32, %arg1: i32) -> (i32, i32) {
    %c0_i32 = arith.constant 0 : i32
    %c0_i32_0 = arith.constant 0 : i32
    %c0_i32_1 = arith.constant 0 : i32
    return %c0_i32, %c0_i32_0 : i32, i32
  }
  func.func @transform_5(%arg0: i32, %arg1: i32) -> (i32, i32) {
    %c0_i32 = arith.constant 0 : i32
    %c0_i32_0 = arith.constant 0 : i32
    %c0_i32_1 = arith.constant 0 : i32
    return %c0_i32, %c0_i32_0 : i32, i32
  }
  func.func @transform_6(%arg0: i32, %arg1: i32) -> (i32, i32) {
    %c0_i32 = arith.constant 0 : i32
    %c0_i32_0 = arith.constant 0 : i32
    return %arg0, %c0_i32 : i32, i32
  }
}

module attributes {stable_mosaic.version = 11 : i64} {
  func.func @head_kernel(%arg0: i32, %arg1: memref<8x128xbf16, #tpu.memory_space<vmem>>, %arg2: memref<128x128xbf16, #tpu.memory_space<vmem>>, %arg3: memref<128x128xbf16, #tpu.memory_space<vmem>>, %arg4: memref<1x128xf32, #tpu.memory_space<vmem>>, %arg5: memref<8x128xf32, #tpu.memory_space<vmem>>, %arg6: memref<8x128xf32, #tpu.memory_space<vmem>>) attributes {dimension_semantics = [#tpu.dimension_semantics<arbitrary>], iteration_bounds = array<i64: 1>, scalar_prefetch = 0 : i64, scratch_operands = 1 : i64, tpu.core_type = #tpu.core_type<tc>, window_params = [{transform_indices = @transform_0, window_bounds = array<i64: 8, 128>}, {transform_indices = @transform_1, window_bounds = array<i64: 128, 128>}, {pipeline_mode = #tpu.pipeline_mode<synchronous>, transform_indices = @transform_2, window_bounds = array<i64: 128, 128>}, {pipeline_mode = #tpu.pipeline_mode<synchronous>, transform_indices = @transform_3, window_bounds = array<i64: 1, 128>}, {pipeline_mode = #tpu.pipeline_mode<synchronous>, transform_indices = @transform_4, window_bounds = array<i64: 8, 128>}]} {
    %c0_i32 = arith.constant 0 : i32
    %0 = arith.cmpi eq, %arg0, %c0_i32 : i32
    %1 = arith.extui %0 : i1 to i32
    %c0_i32_0 = arith.constant 0 : i32
    %2 = arith.cmpi ne, %1, %c0_i32_0 : i32
    scf.if %2 {
      %cst_10 = arith.constant 0.000000e+00 : f32
      %12 = vector.broadcast %cst_10 : f32 to vector<8x128xf32>
      %c0_11 = arith.constant 0 : index
      %c0_12 = arith.constant 0 : index
      %13 = vector.load %arg6[%c0_11, %c0_12] : memref<8x128xf32, #tpu.memory_space<vmem>>, vector<8x128xf32>
      tpu.vector_store %arg6[%c0_11, %c0_12], %12 {strides = array<i32>} : memref<8x128xf32, #tpu.memory_space<vmem>>, vector<8x128xf32>,
    } else {
    }
    %c0 = arith.constant 0 : index
    %c0_1 = arith.constant 0 : index
    %3 = vector.load %arg6[%c0, %c0_1] : memref<8x128xf32, #tpu.memory_space<vmem>>, vector<8x128xf32>
    %c0_2 = arith.constant 0 : index
    %c0_3 = arith.constant 0 : index
    %4 = vector.load %arg1[%c0_2, %c0_3] : memref<8x128xbf16, #tpu.memory_space<vmem>>, vector<8x128xbf16>
    %c0_4 = arith.constant 0 : index
    %c0_5 = arith.constant 0 : index
    %5 = vector.load %arg2[%c0_4, %c0_5] : memref<128x128xbf16, #tpu.memory_space<vmem>>, vector<128x128xbf16>
    %cst = arith.constant dense<0.000000e+00> : vector<8x128xf32>
    %6 = tpu.matmul %4, %5, %cst {dimension_numbers = #tpu.dot_dimension_numbers<[1], [0], [0], [1], [0, 0, 1, 1], [], []>} : vector<8x128xbf16>, vector<128x128xbf16>, vector<8x128xf32> -> vector<8x128xf32>
    %7 = arith.addf %3, %6 : vector<8x128xf32>
    %c0_6 = arith.constant 0 : index
    %c0_7 = arith.constant 0 : index
    %8 = vector.load %arg6[%c0_6, %c0_7] : memref<8x128xf32, #tpu.memory_space<vmem>>, vector<8x128xf32>
    tpu.vector_store %arg6[%c0_6, %c0_7], %7 {strides = array<i32>} : memref<8x128xf32, #tpu.memory_space<vmem>>, vector<8x128xf32>,
    %c0_i32_8 = arith.constant 0 : i32
    %9 = arith.cmpi eq, %arg0, %c0_i32_8 : i32
    %10 = arith.extui %9 : i1 to i32
    %c0_i32_9 = arith.constant 0 : i32
    %11 = arith.cmpi ne, %10, %c0_i32_9 : i32
    scf.if %11 {
      %c0_10 = arith.constant 0 : index
      %c0_11 = arith.constant 0 : index
      %12 = vector.load %arg6[%c0_10, %c0_11] : memref<8x128xf32, #tpu.memory_space<vmem>>, vector<8x128xf32>
      %13 = arith.truncf %12 : vector<8x128xf32> to vector<8x128xbf16>
      %c0_12 = arith.constant 0 : index
      %c0_13 = arith.constant 0 : index
      %14 = vector.load %arg3[%c0_12, %c0_13] : memref<128x128xbf16, #tpu.memory_space<vmem>>, vector<128x128xbf16>
      %cst_14 = arith.constant dense<0.000000e+00> : vector<8x128xf32>
      %15 = tpu.matmul %13, %14, %cst_14 {dimension_numbers = #tpu.dot_dimension_numbers<[1], [0], [0], [1], [0, 0, 1, 1], [], []>} : vector<8x128xbf16>, vector<128x128xbf16>, vector<8x128xf32> -> vector<8x128xf32>
      %c0_15 = arith.constant 0 : index
      %c0_16 = arith.constant 0 : index
      %16 = vector.load %arg4[%c0_15, %c0_16] : memref<1x128xf32, #tpu.memory_space<vmem>>, vector<1x128xf32>
      %17 = vector.broadcast %16 : vector<1x128xf32> to vector<8x128xf32>
      %18 = arith.addf %15, %17 : vector<8x128xf32>
      %c0_17 = arith.constant 0 : index
      %c0_18 = arith.constant 0 : index
      %19 = vector.load %arg5[%c0_17, %c0_18] : memref<8x128xf32, #tpu.memory_space<vmem>>, vector<8x128xf32>
      tpu.vector_store %arg5[%c0_17, %c0_18], %18 {strides = array<i32>} : memref<8x128xf32, #tpu.memory_space<vmem>>, vector<8x128xf32>,
    } else {
    }
    return
  }
  func.func @transform_0(%arg0: i32) -> (i32, i32) {
    %c0_i32 = arith.constant 0 : i32
    %c0_i32_0 = arith.constant 0 : i32
    return %c0_i32, %arg0 : i32, i32
  }
  func.func @transform_1(%arg0: i32) -> (i32, i32) {
    %c0_i32 = arith.constant 0 : i32
    %c0_i32_0 = arith.constant 0 : i32
    return %arg0, %c0_i32 : i32, i32
  }
  func.func @transform_2(%arg0: i32) -> (i32, i32) {
    %c0_i32 = arith.constant 0 : i32
    %c0_i32_0 = arith.constant 0 : i32
    %c0_i32_1 = arith.constant 0 : i32
    return %c0_i32, %c0_i32_0 : i32, i32
  }
  func.func @transform_3(%arg0: i32) -> (i32, i32) {
    %c0_i32 = arith.constant 0 : i32
    %c0_i32_0 = arith.constant 0 : i32
    %c0_i32_1 = arith.constant 0 : i32
    return %c0_i32, %c0_i32_0 : i32, i32
  }
  func.func @transform_4(%arg0: i32) -> (i32, i32) {
    %c0_i32 = arith.constant 0 : i32
    %c0_i32_0 = arith.constant 0 : i32
    %c0_i32_1 = arith.constant 0 : i32
    return %c0_i32, %c0_i32_0 : i32, i32
  }
}

</mosaic_0001>

<bundles_post_ra>
// kernel: gin_forward.5
= control target key start
LH: loop header
LB: loop body
LE: loop exit
PB: predicated region body
PF: predicated region fallthrough
CT: control target
= control target key end

     0   :  { %v345_v0 = vmov 0.0   ;;  %vm346_vm0 = vmmov 0   ;;  %s429_s1 = inlined_call_operand.vmem [shape: bf16[128,128], index: 1, kind: input, shape index: {}]   ;;  %s430_s2 = inlined_call_operand.vmem [shape: bf16[128,128], index: 2, kind: input, shape index: {}]   ;;  %s431_s0 = inlined_call_operand.vmem [shape: bf16[8,128], index: 0, kind: input, shape index: {}]   ;;  %s432_s3 = inlined_call_operand.vmem [shape: f32[1,128], index: 3, kind: input, shape index: {}]   ;;  %s433_s4 = inlined_call_operand.vmem [shape: f32[8,128], index: 4, kind: output, shape index: {}]  }
   0x1   :  { %287 = vmatprep.subr.bf16.mxu0 %v345_v0  ;;  %v329_v1 = vld [vmem:[%s429_s1] sm:$0xff]   ;;  %303 = vmatprep.mubr.msk.bf16.mxu0 %vm346_vm0, %v345_v0  ;;  %v330_v2 = vld [vmem:[%s429_s1 + $0x8] sm:$0xff]   ;;  %v331_v3 = vld [vmem:[%s429_s1 + $0x10] sm:$0xff]  }
   0x2   :  { %307 = vmatprep.subr.bf16.mxu1 %v345_v0  ;;  %323 = vmatprep.mubr.msk.bf16.mxu1 %vm346_vm0, %v345_v0  ;;  %v337_v4 = vld [vmem:[%s430_s2] sm:$0xff]   ;;  %v332_v5 = vld [vmem:[%s429_s1 + $0x18] sm:$0xff]   ;;  %v338_v6 = vld [vmem:[%s430_s2 + $0x8] sm:$0xff]  }
   0x3   :  { %288 = vmatpush3.bf16.msra.mxu0 %v329_v1  ;;  %308 = vmatpush3.bf16.msra.mxu1 %v337_v4  ;;  %v333_v7 = vld [vmem:[%s429_s1 + $0x20] sm:$0xff]   ;;  %v339_v8 = vld [vmem:[%s430_s2 + $0x10] sm:$0xff]   ;;  %v334_v9 = vld [vmem:[%s429_s1 + $0x28] sm:$0xff]  }
   0x4   :  { %289 = vmatprep.subr.bf16.mxu0 %v345_v0  ;;  %309 = vmatprep.subr.bf16.mxu1 %v345_v0  ;;  %v340_v10 = vld [vmem:[%s430_s2 + $0x18] sm:$0xff]   ;;  %v335_v11 = vld [vmem:[%s429_s1 + $0x30] sm:$0xff]   ;;  %v341_v12 = vld [vmem:[%s430_s2 + $0x20] sm:$0xff]  }
   0x5   :  { %v336_v13 = vld [vmem:[%s429_s1 + $0x38] sm:$0xff]   ;;  %v342_v14 = vld [vmem:[%s430_s2 + $0x28] sm:$0xff]   ;;  %v24_v15 = vld [vmem:[%s431_s0] sm:$0xf] }
   0x6   :  { %v343_v16 = vld [vmem:[%s430_s2 + $0x30] sm:$0xff]   ;;  %v344_v17 = vld [vmem:[%s430_s2 + $0x38] sm:$0xff]   ;;  %v260_v23 = vld [vmem:[%s432_s3] ss:$0 sm:$0xff] }
   0x7   :  { %290 = vmatpush3.bf16.msra.mxu0 %v330_v2  ;;  %310 = vmatpush3.bf16.msra.mxu1 %v338_v6 }
   0x8   :  { %291 = vmatprep.subr.bf16.mxu0 %v345_v0  ;;  %311 = vmatprep.subr.bf16.mxu1 %v345_v0 }
   0xb   :  { %292 = vmatpush3.bf16.msra.mxu0 %v331_v3  ;;  %312 = vmatpush3.bf16.msra.mxu1 %v339_v8 }
   0xc   :  { %293 = vmatprep.subr.bf16.mxu0 %v345_v0  ;;  %313 = vmatprep.subr.bf16.mxu1 %v345_v0 }
   0xf   :  { %294 = vmatpush3.bf16.msra.mxu0 %v332_v5  ;;  %314 = vmatpush3.bf16.msra.mxu1 %v340_v10 }
  0x10   :  { %295 = vmatprep.subr.bf16.mxu0 %v345_v0  ;;  %315 = vmatprep.subr.bf16.mxu1 %v345_v0 }
  0x13   :  { %296 = vmatpush3.bf16.msra.mxu0 %v333_v7  ;;  %316 = vmatpush3.bf16.msra.mxu1 %v341_v12 }
  0x14   :  { %297 = vmatprep.subr.bf16.mxu0 %v345_v0  ;;  %317 = vmatprep.subr.bf16.mxu1 %v345_v0 }
  0x17   :  { %298 = vmatpush3.bf16.msra.mxu0 %v334_v9  ;;  %318 = vmatpush3.bf16.msra.mxu1 %v342_v14 }
  0x18   :  { %299 = vmatprep.subr.bf16.mxu0 %v345_v0  ;;  %319 = vmatprep.subr.bf16.mxu1 %v345_v0 }
  0x1b   :  { %300 = vmatpush3.bf16.msra.mxu0 %v335_v11  ;;  %320 = vmatpush3.bf16.msra.mxu1 %v343_v16 }
  0x1c   :  { %301 = vmatprep.subr.bf16.mxu0 %v345_v0  ;;  %321 = vmatprep.subr.bf16.mxu1 %v345_v0 }
  0x1f   :  { %302 = vmatpush3.bf16.msra.mxu0 %v336_v13  ;;  %322 = vmatpush3.bf16.msra.mxu1 %v344_v17 }
  0x22   :  { %304 = vmatmul.mubr.bf16.vlgmr.msra.gmra.mrb[0].mxu0 %v24_v15 }
  0xf5   :  { %v123_v18 = vpop.f32.mrb[0].mxu0 }
  0xf6   :  { %v135_v19 = vpack.c.bf16 %v123_v18, %v123_v18  ;;  %v305_v20 = vpop.f32.mrb[1].mxu0 }
  0xf7   :  { %v126_v21 = vpop.f32.mrb[2].mxu0 }
  0xf8   :  { %v306_v22 = vpop.f32.mrb[3].mxu0  ;;  %324 = vmatmul.mubr.bf16.vlgmr.msra.gmra.mrb[0].mxu1 %v135_v19 }
 0x1cb   :  { %v241_v24 = vpop.f32.mrb[0].mxu1 }
 0x1cc   :  { %v242_v25 = vadd.f32 %v260_v23, %v241_v24  ;;  %v325_v26 = vpop.f32.mrb[1].mxu1 }
 0x1cd   :  { %v244_v27 = vpop.f32.mrb[2].mxu1 }
 0x1ce   :  { %247 = vst [vmem:[%s433_s4] sm:$0xff] %v242_v25  ;;  %v326_v28 = vpop.f32.mrb[3].mxu1 }

// kernel: gin_forward.3
= control target key start
LH: loop header
LB: loop body
LE: loop exit
PB: predicated region body
PF: predicated region fallthrough
CT: control target
= control target key end

     0   :  { %s1370_s1 = inlined_call_operand.vmem [shape: bf16[128,128], index: 1, kind: input, shape index: {}]   ;;  %s1371_s0 = inlined_call_operand.vmem [shape: bf16[128,128], index: 0, kind: input, shape index: {}]   ;;  %s1372_s2 = inlined_call_operand.vmem [shape: bf16[128,128], index: 2, kind: input, shape index: {}]   ;;  %s1373_s4 = inlined_call_operand.vmem [shape: bf16[128,128], index: 4, kind: input, shape index: {}]   ;;  %s1374_s3 = inlined_call_operand.vmem [shape: f32[1,128], index: 3, kind: input, shape index: {}]   ;;  %s1375_s5 = inlined_call_operand.vmem [shape: f32[1,128], index: 5, kind: input, shape index: {}]   ;;  %s1376_s6 = inlined_call_operand.vmem [shape: bf16[128,128], index: 6, kind: output, shape index: {}]  }
   0x1   :  { %v1141_v0 = vld [vmem:[%s1370_s1] sm:$0xff]   ;;  %v1142_v1 = vld [vmem:[%s1370_s1 + $0x8] sm:$0xff]   ;;  %v1143_v2 = vld [vmem:[%s1370_s1 + $0x10] sm:$0xff]  }
   0x2   :  { %1029 = vmatprep.subr.bf16.mxu0 %v1141_v0  ;;  %v1144_v3 = vld [vmem:[%s1370_s1 + $0x18] sm:$0xff]   ;;  %v1149_v4 = vld [vmem:[%s1371_s0] sm:$0xff]   ;;  %v1146_v6 = vld [vmem:[%s1370_s1 + $0x28] sm:$0xff]  }
   0x3   :  { %1030 = vmatpush3.bf16.msra.mxu0 %v1141_v0  ;;  %1045 = vmatprep.mubr.bf16.mxu0 %v1149_v4  ;;  %v1145_v5 = vld [vmem:[%s1370_s1 + $0x20] sm:$0xff]   ;;  %v1158_v8 = vld [vmem:[%s1372_s2 + $0x8] sm:$0xff]   ;;  %v1147_v9 = vld [vmem:[%s1370_s1 + $0x30] sm:$0xff]  }
   0x4   :  { %1031 = vmatprep.subr.bf16.mxu0 %v1142_v1  ;;  %v1157_v7 = vld [vmem:[%s1372_s2] sm:$0xff]   ;;  %v1159_v10 = vld [vmem:[%s1372_s2 + $0x10] sm:$0xff]   ;;  %v1148_v11 = vld [vmem:[%s1370_s1 + $0x38] sm:$0xff]  }
   0x5   :  { %1061 = vmatprep.subr.bf16.mxu1 %v1157_v7  ;;  %v1160_v12 = vld [vmem:[%s1372_s2 + $0x18] sm:$0xff]   ;;  %v1161_v13 = vld [vmem:[%s1372_s2 + $0x20] sm:$0xff]   ;;  %v1150_v14 = vld [vmem:[%s1371_s0 + $0x8] sm:$0xff]  }
   0x6   :  { %1062 = vmatpush3.bf16.msra.mxu1 %v1157_v7  ;;  %v1151_v15 = vld [vmem:[%s1371_s0 + $0x10] sm:$0xff]   ;;  %v1162_v16 = vld [vmem:[%s1372_s2 + $0x28] sm:$0xff]   ;;  %v1152_v18 = vld [vmem:[%s1371_s0 + $0x18] sm:$0xff]  }
   0x7   :  { %1032 = vmatpush3.bf16.msra.mxu0 %v1142_v1  ;;  %1063 = vmatprep.subr.bf16.mxu1 %v1158_v8  ;;  %v1163_v17 = vld [vmem:[%s1372_s2 + $0x30] sm:$0xff]   ;;  %v1153_v19 = vld [vmem:[%s1371_s0 + $0x20] sm:$0xff]   ;;  %v1154_v20 = vld [vmem:[%s1371_s0 + $0x28] sm:$0xff]  }
   0x8   :  { %1033 = vmatprep.subr.bf16.mxu0 %v1143_v2  ;;  %v1155_v21 = vld [vmem:[%s1371_s0 + $0x30] sm:$0xff]   ;;  %v1156_v22 = vld [vmem:[%s1371_s0 + $0x38] sm:$0xff]   ;;  %v1165_v24 = vld [vmem:[%s1373_s4] sm:$0xff]  }
   0x9   :  { %v1164_v23 = vld [vmem:[%s1372_s2 + $0x38] sm:$0xff]   ;;  %v1166_v25 = vld [vmem:[%s1373_s4 + $0x8] sm:$0xff]   ;;  %v1167_v26 = vld [vmem:[%s1373_s4 + $0x10] sm:$0xff]  }
   0xa   :  { %1064 = vmatpush3.bf16.msra.mxu1 %v1158_v8  ;;  %v1168_v27 = vld [vmem:[%s1373_s4 + $0x18] sm:$0xff]   ;;  %v1169_v28 = vld [vmem:[%s1373_s4 + $0x20] sm:$0xff]   ;;  %v1170_v53 = vld [vmem:[%s1373_s4 + $0x28] sm:$0xff]  }
   0xb   :  { %1034 = vmatpush3.bf16.msra.mxu0 %v1143_v2  ;;  %1065 = vmatprep.subr.bf16.mxu1 %v1159_v10  ;;  %v1171_v54 = vld [vmem:[%s1373_s4 + $0x30] sm:$0xff]   ;;  %v1172_v55 = vld [vmem:[%s1373_s4 + $0x38] sm:$0xff]   ;;  %v1307_v56 = vld [vmem:[%s1374_s3] ss:$0 sm:$0xff] }
   0xc   :  { %1035 = vmatprep.subr.bf16.mxu0 %v1144_v3 }
   0xe   :  { %1066 = vmatpush3.bf16.msra.mxu1 %v1159_v10 }
   0xf   :  { %1036 = vmatpush3.bf16.msra.mxu0 %v1144_v3  ;;  %1067 = vmatprep.subr.bf16.mxu1 %v1160_v12 }
  0x10   :  { %1037 = vmatprep.subr.bf16.mxu0 %v1145_v5 }
  0x12   :  { %1068 = vmatpush3.bf16.msra.mxu1 %v1160_v12 }
  0x13   :  { %1038 = vmatpush3.bf16.msra.mxu0 %v1145_v5  ;;  %1069 = vmatprep.subr.bf16.mxu1 %v1161_v13 }
  0x14   :  { %1039 = vmatprep.subr.bf16.mxu0 %v1146_v6 }
  0x16   :  { %1070 = vmatpush3.bf16.msra.mxu1 %v1161_v13 }
  0x17   :  { %1040 = vmatpush3.bf16.msra.mxu0 %v1146_v6  ;;  %1071 = vmatprep.subr.bf16.mxu1 %v1162_v16 }
  0x18   :  { %1041 = vmatprep.subr.bf16.mxu0 %v1147_v9 }
  0x1a   :  { %1072 = vmatpush3.bf16.msra.mxu1 %v1162_v16 }
  0x1b   :  { %1042 = vmatpush3.bf16.msra.mxu0 %v1147_v9  ;;  %1073 = vmatprep.subr.bf16.mxu1 %v1163_v17 }
  0x1c   :  { %1043 = vmatprep.subr.bf16.mxu0 %v1148_v11 }
  0x1e   :  { %1074 = vmatpush3.bf16.msra.mxu1 %v1163_v17 }
  0x1f   :  { %1044 = vmatpush3.bf16.msra.mxu0 %v1148_v11  ;;  %1075 = vmatprep.subr.bf16.mxu1 %v1164_v23 }
  0x20   :  { %1093 = vmatprep.subr.bf16.mxu0 %v1165_v24 }
  0x22   :  { %1046 = vmatmul.mubr.bf16.vlgmr.msra.gmra.mrb[0].mxu0 %v1150_v14  ;;  %1076 = vmatpush3.bf16.msra.mxu1 %v1164_v23 }
  0x23   :  { %1049 = vmatprep.mubr.bf16.mxu0 %v1151_v15  ;;  %1125 = vmatprep.subr.bf16.mxu1 %v1165_v24 }
  0x24   :  { %1094 = vmatpush3.bf16.msra.mxu0 %v1165_v24 }
  0x25   :  { %1095 = vmatprep.subr.bf16.mxu0 %v1166_v25 }
  0x28   :  { %1096 = vmatpush3.bf16.msra.mxu0 %v1166_v25 }
  0x29   :  { %1097 = vmatprep.subr.bf16.mxu0 %v1167_v26 }
  0x2a   :  { %1050 = vmatmul.mubr.bf16.gmra.mrb[4].mxu0 %v1152_v18 }
  0x2b   :  { %1053 = vmatprep.mubr.bf16.mxu0 %v1153_v19 }
  0x2c   :  { %1098 = vmatpush3.bf16.msra.mxu0 %v1167_v26 }
  0x2d   :  { %1099 = vmatprep.subr.bf16.mxu0 %v1168_v27 }
  0x30   :  { %1100 = vmatpush3.bf16.msra.mxu0 %v1168_v27 }
  0x31   :  { %1101 = vmatprep.subr.bf16.mxu0 %v1169_v28 }
  0x32   :  { %1054 = vmatmul.mubr.bf16.gmra.mrb[8].mxu0 %v1154_v20 }
  0x33   :  { %1057 = vmatprep.mubr.bf16.mxu0 %v1155_v21 }
  0x34   :  { %1102 = vmatpush3.bf16.msra.mxu0 %v1169_v28 }
  0x35   :  { %1103 = vmatprep.subr.bf16.mxu0 %v1170_v53 }
  0x38   :  { %1104 = vmatpush3.bf16.msra.mxu0 %v1170_v53 }
  0x39   :  { %1105 = vmatprep.subr.bf16.mxu0 %v1171_v54 }
  0x3a   :  { %1058 = vmatmul.mubr.bf16.gmra.mrb[12].mxu0 %v1156_v22 }
  0x3c   :  { %1106 = vmatpush3.bf16.msra.mxu0 %v1171_v54 }
  0x3d   :  { %1107 = vmatprep.subr.bf16.mxu0 %v1172_v55 }
  0x40   :  { %1108 = vmatpush3.bf16.msra.mxu0 %v1172_v55 }
  0xf5   :  { %v1047_v29 = vpop.f32.mrb[0].mxu0 }
  0xf6   :  { %v222_v30 = vpop.f32.mrb[1].mxu0 }
  0xf7   :  { %v1048_v31 = vpop.f32.mrb[2].mxu0 }
  0xf8   :  { %v337_v32 = vpack.c.bf16 %v1048_v31, %v1047_v29  ;;  %v225_v33 = vpop.f32.mrb[3].mxu0 }
  0xf9   :  { %v336_v34 = vpack.c.bf16 %v225_v33, %v222_v30 }
  0xfb   :  { %1077 = vmatprep.mubr.bf16.mxu1 %v336_v34 }
  0xfc   :  { %1078 = vmatmul.mubr.bf16.vlgmr.msra.gmra.mrb[0].mxu1 %v337_v32 }
  0xfd   :  { %v1051_v35 = vpop.f32.mrb[4].mxu0  ;;  %1133 = vmatpush3.bf16.msra.mxu1 %v1165_v24 }
  0xfe   :  { %v238_v36 = vpop.f32.mrb[5].mxu0  ;;  %1126 = vmatprep.subr.bf16.mxu1 %v1166_v25 }
  0xff   :  { %v1052_v37 = vpop.f32.mrb[6].mxu0 }
 0x100   :  { %v339_v38 = vpack.c.bf16 %v1052_v37, %v1051_v35  ;;  %v241_v39 = vpop.f32.mrb[7].mxu0 }
 0x101   :  { %v338_v40 = vpack.c.bf16 %v241_v39, %v238_v36  ;;  %1134 = vmatpush3.bf16.msra.mxu1 %v1166_v25 }
 0x102   :  { %1127 = vmatprep.subr.bf16.mxu1 %v1167_v26 }
 0x103   :  { %1081 = vmatprep.mubr.bf16.mxu1 %v338_v40 }
 0x104   :  { %1082 = vmatmul.mubr.bf16.gmra.mrb[4].mxu1 %v339_v38 }
 0x105   :  { %v1055_v41 = vpop.f32.mrb[8].mxu0  ;;  %1135 = vmatpush3.bf16.msra.mxu1 %v1167_v26 }
 0x106   :  { %v254_v42 = vpop.f32.mrb[9].mxu0  ;;  %1128 = vmatprep.subr.bf16.mxu1 %v1168_v27 }
 0x107   :  { %v1056_v43 = vpop.f32.mrb[10].mxu0 }
 0x108   :  { %v341_v44 = vpack.c.bf16 %v1056_v43, %v1055_v41  ;;  %v257_v45 = vpop.f32.mrb[11].mxu0 }
 0x109   :  { %v340_v46 = vpack.c.bf16 %v257_v45, %v254_v42  ;;  %1136 = vmatpush3.bf16.msra.mxu1 %v1168_v27 }
 0x10a   :  { %1129 = vmatprep.subr.bf16.mxu1 %v1169_v28 }
 0x10b   :  { %1085 = vmatprep.mubr.bf16.mxu1 %v340_v46 }
 0x10c   :  { %1086 = vmatmul.mubr.bf16.gmra.mrb[8].mxu1 %v341_v44 }
 0x10d   :  { %v1059_v47 = vpop.f32.mrb[12].mxu0  ;;  %1137 = vmatpush3.bf16.msra.mxu1 %v1169_v28 }
 0x10e   :  { %v270_v48 = vpop.f32.mrb[13].mxu0  ;;  %1130 = vmatprep.subr.bf16.mxu1 %v1170_v53 }
 0x10f   :  { %v1060_v49 = vpop.f32.mrb[14].mxu0 }
 0x110   :  { %v343_v50 = vpack.c.bf16 %v1060_v49, %v1059_v47  ;;  %v273_v51 = vpop.f32.mrb[15].mxu0 }
 0x111   :  { %v342_v52 = vpack.c.bf16 %v273_v51, %v270_v48  ;;  %1138 = vmatpush3.bf16.msra.mxu1 %v1170_v53 }
 0x112   :  { %1131 = vmatprep.subr.bf16.mxu1 %v1171_v54 }
 0x113   :  { %1089 = vmatprep.mubr.bf16.mxu1 %v342_v52 }
 0x114   :  { %1090 = vmatmul.mubr.bf16.gmra.mrb[12].mxu1 %v343_v50 }
 0x115   :  { %1139 = vmatpush3.bf16.msra.mxu1 %v1171_v54 }
 0x116   :  { %1132 = vmatprep.subr.bf16.mxu1 %v1172_v55 }
 0x119   :  { %1140 = vmatpush3.bf16.msra.mxu1 %v1172_v55 }
 0x1cf   :  { %v1079_v57 = vpop.f32.mrb[0].mxu1 }
 0x1d0   :  { %v458_v58 = vadd.f32 %v1079_v57, %v1307_v56  ;;  %v449_v59 = vpop.f32.mrb[1].mxu1 }
 0x1d1   :  { %v450_v60 = vadd.f32 %v1307_v56, %v449_v59  ;;  %v1080_v61 = vpop.f32.mrb[2].mxu1 }
 0x1d2   :  { %v530_v62 = vmul.f32 0.2, %v458_v58  ;;  %v461_v63 = vadd.f32 %v1080_v61, %v1307_v56  ;;  %v452_v0 = vpop.f32.mrb[3].mxu1  ;;  %vm514_vm0 = vcmp.gt.f32.partialorder %v458_v58, 0.0 }
 0x1d3   :  { %v528_v1 = vmul.f32 0.2, %v450_v60  ;;  %v453_v2 = vadd.f32 %v1307_v56, %v452_v0  ;;  %vm512_vm1 = vcmp.gt.f32.partialorder %v450_v60, 0.0 }
 0x1d4   :  { %vm515_vm2 = vcmp.gt.f32.partialorder %v461_v63, 0.0  ;;  %v531_v3 = vmul.f32 0.2, %v461_v63  ;;  %v546_v5 = vsel %vm514_vm0, %v458_v58, %v530_v62 }
 0x1d5   :  { %vm513_vm3 = vcmp.gt.f32.partialorder %v453_v2, 0.0  ;;  %v529_v4 = vmul.f32 0.2, %v453_v2  ;;  %v544_v9 = vsel %vm512_vm1, %v450_v60, %v528_v1 }
 0x1d6   :  { %v547_v6 = vsel %vm515_vm2, %v461_v63, %v531_v3 }
 0x1d7   :  { %v561_v7 = vpack.c.bf16 %v547_v6, %v546_v5  ;;  %v1083_v8 = vpop.f32.mrb[4].mxu1  ;;  %v545_v10 = vsel %vm513_vm3, %v453_v2, %v529_v4  ;;  %v1328_v2 = vld [vmem:[%s1375_s5] ss:$0 sm:$0xff] }
 0x1d8   :  { %v474_v11 = vadd.f32 %v1083_v8, %v1307_v56  ;;  %v465_v12 = vpop.f32.mrb[5].mxu1  ;;  %v560_v13 = vpack.c.bf16 %v545_v10, %v544_v9 }
 0x1d9   :  { %v466_v14 = vadd.f32 %v1307_v56, %v465_v12  ;;  %v1084_v15 = vpop.f32.mrb[6].mxu1 }
 0x1da   :  { %v534_v16 = vmul.f32 0.2, %v474_v11  ;;  %v477_v17 = vadd.f32 %v1084_v15, %v1307_v56  ;;  %v468_v18 = vpop.f32.mrb[7].mxu1  ;;  %1109 = vmatprep.mubr.bf16.mxu0 %v560_v13  ;;  %vm518_vm4 = vcmp.gt.f32.partialorder %v474_v11, 0.0 }
 0x1db   :  { %v532_v19 = vmul.f32 0.2, %v466_v14  ;;  %v469_v20 = vadd.f32 %v1307_v56, %v468_v18  ;;  %1110 = vmatmul.mubr.bf16.vlgmr.msra.gmra.mrb[16].mxu0 %v561_v7  ;;  %vm516_vm5 = vcmp.gt.f32.partialorder %v466_v14, 0.0 }
 0x1dc   :  { %vm519_vm6 = vcmp.gt.f32.partialorder %v477_v17, 0.0  ;;  %v535_v21 = vmul.f32 0.2, %v477_v17  ;;  %v550_v23 = vsel %vm518_vm4, %v474_v11, %v534_v16 }
 0x1dd   :  { %vm517_vm7 = vcmp.gt.f32.partialorder %v469_v20, 0.0  ;;  %v533_v22 = vmul.f32 0.2, %v469_v20  ;;  %v548_v26 = vsel %vm516_vm5, %v466_v14, %v532_v19 }
 0x1de   :  { %v551_v24 = vsel %vm519_vm6, %v477_v17, %v535_v21 }
 0x1df   :  { %v1087_v25 = vpop.f32.mrb[8].mxu1  ;;  %v549_v27 = vsel %vm517_vm7, %v469_v20, %v533_v22  ;;  %v563_v28 = vpack.c.bf16 %v551_v24, %v550_v23 }
 0x1e0   :  { %v490_v29 = vadd.f32 %v1087_v25, %v1307_v56  ;;  %v481_v30 = vpop.f32.mrb[9].mxu1  ;;  %v562_v31 = vpack.c.bf16 %v549_v27, %v548_v26 }
 0x1e1   :  { %v482_v32 = vadd.f32 %v1307_v56, %v481_v30  ;;  %v1088_v33 = vpop.f32.mrb[10].mxu1 }
 0x1e2   :  { %v538_v34 = vmul.f32 0.2, %v490_v29  ;;  %v493_v35 = vadd.f32 %v1088_v33, %v1307_v56  ;;  %v484_v36 = vpop.f32.mrb[11].mxu1  ;;  %1113 = vmatprep.mubr.bf16.mxu0 %v562_v31  ;;  %vm522_vm8 = vcmp.gt.f32.partialorder %v490_v29, 0.0 }
 0x1e3   :  { %v536_v37 = vmul.f32 0.2, %v482_v32  ;;  %v485_v38 = vadd.f32 %v1307_v56, %v484_v36  ;;  %1114 = vmatmul.mubr.bf16.gmra.mrb[20].mxu0 %v563_v28  ;;  %vm520_vm9 = vcmp.gt.f32.partialorder %v482_v32, 0.0 }
 0x1e4   :  { %vm523_vm10 = vcmp.gt.f32.partialorder %v493_v35, 0.0  ;;  %v539_v39 = vmul.f32 0.2, %v493_v35  ;;  %v554_v41 = vsel %vm522_vm8, %v490_v29, %v538_v34 }
 0x1e5   :  { %vm521_vm11 = vcmp.gt.f32.partialorder %v485_v38, 0.0  ;;  %v537_v40 = vmul.f32 0.2, %v485_v38  ;;  %v552_v45 = vsel %vm520_vm9, %v482_v32, %v536_v37 }
 0x1e6   :  { %v555_v42 = vsel %vm523_vm10, %v493_v35, %v539_v39 }
 0x1e7   :  { %v565_v43 = vpack.c.bf16 %v555_v42, %v554_v41  ;;  %v1091_v44 = vpop.f32.mrb[12].mxu1  ;;  %v553_v46 = vsel %vm521_vm11, %v485_v38, %v537_v40 }
 0x1e8   :  { %v506_v47 = vadd.f32 %v1091_v44, %v1307_v56  ;;  %v497_v48 = vpop.f32.mrb[13].mxu1  ;;  %v564_v49 = vpack.c.bf16 %v553_v46, %v552_v45 }
 0x1e9   :  { %v498_v50 = vadd.f32 %v1307_v56, %v497_v48  ;;  %v1092_v51 = vpop.f32.mrb[14].mxu1 }
 0x1ea   :  { %v542_v52 = vmul.f32 0.2, %v506_v47  ;;  %v509_v53 = vadd.f32 %v1092_v51, %v1307_v56  ;;  %v500_v54 = vpop.f32.mrb[15].mxu1  ;;  %1117 = vmatprep.mubr.bf16.mxu1 %v564_v49  ;;  %vm526_vm12 = vcmp.gt.f32.partialorder %v506_v47, 0.0 }
 0x1eb   :  { %v540_v55 = vmul.f32 0.2, %v498_v50  ;;  %v501_v57 = vadd.f32 %v1307_v56, %v500_v54  ;;  %1118 = vmatmul.mubr.bf16.vlgmr.msra.gmra.mrb[16].mxu1 %v565_v43  ;;  %vm524_vm13 = vcmp.gt.f32.partialorder %v498_v50, 0.0 }
 0x1ec   :  { %vm527_vm14 = vcmp.gt.f32.partialorder %v509_v53, 0.0  ;;  %v543_v58 = vmul.f32 0.2, %v509_v53  ;;  %v558_v60 = vsel %vm526_vm12, %v506_v47, %v542_v52 }
 0x1ed   :  { %vm525_vm15 = vcmp.gt.f32.partialorder %v501_v57, 0.0  ;;  %v541_v59 = vmul.f32 0.2, %v501_v57  ;;  %v556_v62 = vsel %vm524_vm13, %v498_v50, %v540_v55 }
 0x1ee   :  { %v559_v61 = vsel %vm527_vm14, %v509_v53, %v543_v58 }
 0x1ef   :  { %v557_v63 = vsel %vm525_vm15, %v501_v57, %v541_v59  ;;  %v567_v0 = vpack.c.bf16 %v559_v61, %v558_v60 }
 0x1f0   :  { %v566_v1 = vpack.c.bf16 %v557_v63, %v556_v62 }
 0x1f2   :  { %1121 = vmatprep.mubr.bf16.mxu1 %v566_v1 }
 0x1f3   :  { %1122 = vmatmul.mubr.bf16.gmra.mrb[20].mxu1 %v567_v0 }
 0x2ae   :  { %v1111_v56 = vpop.f32.mrb[16].mxu0 }
 0x2af   :  { %v682_v3 = vadd.f32 %v1111_v56, %v1328_v2  ;;  %v673_v4 = vpop.f32.mrb[17].mxu0 }
 0x2b0   :  { %v674_v5 = vadd.f32 %v1328_v2, %v673_v4  ;;  %v1112_v6 = vpop.f32.mrb[18].mxu0 }
 0x2b1   :  { %v754_v7 = vmul.f32 0.2, %v682_v3  ;;  %v685_v8 = vadd.f32 %v1112_v6, %v1328_v2  ;;  %v676_v9 = vpop.f32.mrb[19].mxu0  ;;  %vm738_vm0 = vcmp.gt.f32.partialorder %v682_v3, 0.0 }
 0x2b2   :  { %v752_v10 = vmul.f32 0.2, %v674_v5  ;;  %v677_v11 = vadd.f32 %v1328_v2, %v676_v9  ;;  %vm736_vm1 = vcmp.gt.f32.partialorder %v674_v5, 0.0 }
 0x2b3   :  { %vm739_vm2 = vcmp.gt.f32.partialorder %v685_v8, 0.0  ;;  %v755_v12 = vmul.f32 0.2, %v685_v8  ;;  %v770_v14 = vsel %vm738_vm0, %v682_v3, %v754_v7 }
 0x2b4   :  { %vm737_vm3 = vcmp.gt.f32.partialorder %v677_v11, 0.0  ;;  %v753_v13 = vmul.f32 0.2, %v677_v11  ;;  %v768_v16 = vsel %vm736_vm1, %v674_v5, %v752_v10 }
 0x2b5   :  { %v771_v15 = vsel %vm739_vm2, %v685_v8, %v755_v12 }
 0x2b6   :  { %v942_v17 = vpack.c.bf16 %v771_v15, %v770_v14  ;;  %v769_v18 = vsel %vm737_vm3, %v677_v11, %v753_v13  ;;  %v1115_v19 = vpop.f32.mrb[20].mxu0 }
 0x2b7   :  { %v937_v20 = vpack.c.bf16 %v769_v18, %v768_v16  ;;  %v698_v21 = vadd.f32 %v1115_v19, %v1328_v2  ;;  %v689_v22 = vpop.f32.mrb[21].mxu0 }
 0x2b8   :  { %974 = vst [vmem:[%s1376_s6 + $0x8] sm:$0xff] %v942_v17   ;;  %v690_v23 = vadd.f32 %v1328_v2, %v689_v22  ;;  %v1116_v24 = vpop.f32.mrb[22].mxu0 }
 0x2b9   :  { %938 = vst [vmem:[%s1376_s6] sm:$0xff] %v937_v20   ;;  %v758_v25 = vmul.f32 0.2, %v698_v21  ;;  %v701_v26 = vadd.f32 %v1116_v24, %v1328_v2  ;;  %v692_v27 = vpop.f32.mrb[23].mxu0  ;;  %vm742_vm4 = vcmp.gt.f32.partialorder %v698_v21, 0.0 }
 0x2ba   :  { %v756_v28 = vmul.f32 0.2, %v690_v23  ;;  %v693_v29 = vadd.f32 %v1328_v2, %v692_v27  ;;  %vm740_vm5 = vcmp.gt.f32.partialorder %v690_v23, 0.0 }
 0x2bb   :  { %vm743_vm6 = vcmp.gt.f32.partialorder %v701_v26, 0.0  ;;  %v759_v30 = vmul.f32 0.2, %v701_v26  ;;  %v774_v32 = vsel %vm742_vm4, %v698_v21, %v758_v25 }
 0x2bc   :  { %vm741_vm7 = vcmp.gt.f32.partialorder %v693_v29, 0.0  ;;  %v757_v31 = vmul.f32 0.2, %v693_v29  ;;  %v772_v34 = vsel %vm740_vm5, %v690_v23, %v756_v28 }
 0x2bd   :  { %v775_v33 = vsel %vm743_vm6, %v701_v26, %v759_v30 }
 0x2be   :  { %v952_v35 = vpack.c.bf16 %v775_v33, %v774_v32  ;;  %v773_v36 = vsel %vm741_vm7, %v693_v29, %v757_v31  ;;  %v1119_v37 = vpop.f32.mrb[16].mxu1 }
 0x2bf   :  { %v947_v38 = vpack.c.bf16 %v773_v36, %v772_v34  ;;  %v714_v39 = vadd.f32 %v1119_v37, %v1328_v2  ;;  %v705_v40 = vpop.f32.mrb[17].mxu1 }
 0x2c0   :  { %976 = vst [vmem:[%s1376_s6 + $0x18] sm:$0xff] %v952_v35   ;;  %v706_v41 = vadd.f32 %v1328_v2, %v705_v40  ;;  %v1120_v42 = vpop.f32.mrb[18].mxu1 }
 0x2c1   :  { %975 = vst [vmem:[%s1376_s6 + $0x10] sm:$0xff] %v947_v38   ;;  %v762_v43 = vmul.f32 0.2, %v714_v39  ;;  %v717_v44 = vadd.f32 %v1120_v42, %v1328_v2  ;;  %v708_v45 = vpop.f32.mrb[19].mxu1  ;;  %vm746_vm8 = vcmp.gt.f32.partialorder %v714_v39, 0.0 }
 0x2c2   :  { %v760_v46 = vmul.f32 0.2, %v706_v41  ;;  %v709_v47 = vadd.f32 %v1328_v2, %v708_v45  ;;  %vm744_vm9 = vcmp.gt.f32.partialorder %v706_v41, 0.0 }
 0x2c3   :  { %vm747_vm10 = vcmp.gt.f32.partialorder %v717_v44, 0.0  ;;  %v763_v48 = vmul.f32 0.2, %v717_v44  ;;  %v778_v50 = vsel %vm746_vm8, %v714_v39, %v762_v43 }
 0x2c4   :  { %vm745_vm11 = vcmp.gt.f32.partialorder %v709_v47, 0.0  ;;  %v761_v49 = vmul.f32 0.2, %v709_v47  ;;  %v776_v52 = vsel %vm744_vm9, %v706_v41, %v760_v46 }
 0x2c5   :  { %v779_v51 = vsel %vm747_vm10, %v717_v44, %v763_v48 }
 0x2c6   :  { %v962_v53 = vpack.c.bf16 %v779_v51, %v778_v50  ;;  %v777_v54 = vsel %vm745_vm11, %v709_v47, %v761_v49  ;;  %v1123_v55 = vpop.f32.mrb[20].mxu1 }
 0x2c7   :  { %v957_v57 = vpack.c.bf16 %v777_v54, %v776_v52  ;;  %v730_v58 = vadd.f32 %v1123_v55, %v1328_v2  ;;  %v721_v59 = vpop.f32.mrb[21].mxu1 }
 0x2c8   :  { %978 = vst [vmem:[%s1376_s6 + $0x28] sm:$0xff] %v962_v53   ;;  %v722_v60 = vadd.f32 %v1328_v2, %v721_v59  ;;  %v1124_v61 = vpop.f32.mrb[22].mxu1 }
 0x2c9   :  { %977 = vst [vmem:[%s1376_s6 + $0x20] sm:$0xff] %v957_v57   ;;  %v766_v62 = vmul.f32 0.2, %v730_v58  ;;  %v733_v63 = vadd.f32 %v1124_v61, %v1328_v2  ;;  %v724_v0 = vpop.f32.mrb[23].mxu1  ;;  %vm750_vm12 = vcmp.gt.f32.partialorder %v730_v58, 0.0 }
 0x2ca   :  { %v764_v1 = vmul.f32 0.2, %v722_v60  ;;  %v725_v56 = vadd.f32 %v1328_v2, %v724_v0  ;;  %vm748_vm13 = vcmp.gt.f32.partialorder %v722_v60, 0.0 }
 0x2cb   :  { %vm751_vm14 = vcmp.gt.f32.partialorder %v733_v63, 0.0  ;;  %v767_v3 = vmul.f32 0.2, %v733_v63  ;;  %v782_v5 = vsel %vm750_vm12, %v730_v58, %v766_v62 }
 0x2cc   :  { %vm749_vm15 = vcmp.gt.f32.partialorder %v725_v56, 0.0  ;;  %v765_v4 = vmul.f32 0.2, %v725_v56  ;;  %v780_v7 = vsel %vm748_vm13, %v722_v60, %v764_v1 }
 0x2cd   :  { %v783_v6 = vsel %vm751_vm14, %v733_v63, %v767_v3 }
 0x2ce   :  { %v972_v8 = vpack.c.bf16 %v783_v6, %v782_v5  ;;  %v781_v9 = vsel %vm749_vm15, %v725_v56, %v765_v4 }
 0x2cf   :  { %v967_v10 = vpack.c.bf16 %v781_v9, %v780_v7 }
 0x2d0   :  { %980 = vst [vmem:[%s1376_s6 + $0x38] sm:$0xff] %v972_v8  }
 0x2d1   :  { %979 = vst [vmem:[%s1376_s6 + $0x30] sm:$0xff] %v967_v10  }

</bundles_post_ra>
